<compile_context>
chip_gen: v7x
topology: tpu7x:2x2x1
jax: 0.10.0
libtpu: 0.0.40
codegen_flags: <defaults>
</compile_context>

<pallas_src>
import jax
import jax.numpy as jnp
from jax.experimental import pallas as pl
from jax.experimental.pallas import tpu as pltpu


def mlp_kernel(x_ref, w1_ref, b1_ref, w2_ref, b2_ref, w3_ref, b3_ref, o_ref):
    # Activations are (features, batch_tile): batch sits on the 128-lane axis.
    x = x_ref[...]                                                  # (in_f, bt) bf16
    # Layer 1: Linear(in -> 64) + ReLU
    h1 = jnp.dot(w1_ref[...], x, preferred_element_type=jnp.float32)
    h1 = jnp.maximum(h1 + b1_ref[...], 0.0)                         # (64, bt) f32
    # Layer 2: Linear(64 -> 32) + ReLU
    h2 = jnp.dot(w2_ref[...], h1.astype(w2_ref.dtype),
                 preferred_element_type=jnp.float32)
    h2 = jnp.maximum(h2 + b2_ref[...], 0.0)                         # (32, bt) f32
    # Layer 3: Linear(32 -> out), no activation (logits)
    out = jnp.dot(w3_ref[...], h2.astype(w3_ref.dtype),
                  preferred_element_type=jnp.float32)
    o_ref[...] = (out + b3_ref[...]).astype(o_ref.dtype)            # (out_f, bt), lane-dense


def simple_net_forward(x, params, *, batch_tile=1024, compute_dtype=jnp.bfloat16):
    """SimpleNet forward pass via a single Pallas TPU kernel.

    x: (B, in_features) float32
    params (PyTorch nn.Linear layout, (out, in) weights, (out, 1) biases):
        w1 (64, in), b1 (64, 1), w2 (32, 64), b2 (32, 1), w3 (out, 32), b3 (out, 1)
    """
    B, in_f = x.shape
    h1_f = params["w1"].shape[0]
    h2_f = params["w2"].shape[0]
    out_f = params["w3"].shape[0]

    # Pick the batch tile: single tile for small batches (block == full dim is legal),
    # otherwise a multiple of 128 so the lane dimension stays aligned, with zero-padding
    # on the last tile (grid = cdiv) instead of a hard divisibility assert.
    if B <= batch_tile:
        bt = B
        b_pad = B
    else:
        bt = max(128, (batch_tile // 128) * 128)
        b_pad = pl.cdiv(B, bt) * bt

    # Layout plumbing in the wrapper: transpose to batch-on-lanes, cast MXU inputs to bf16.
    x_t = jnp.swapaxes(x, 0, 1).astype(compute_dtype)               # (in_f, B)
    if b_pad != B:
        x_t = jnp.pad(x_t, ((0, 0), (0, b_pad - B)))

    w1 = params["w1"].astype(compute_dtype)
    w2 = params["w2"].astype(compute_dtype)
    w3 = params["w3"].astype(compute_dtype)
    b1 = params["b1"].astype(jnp.float32)
    b2 = params["b2"].astype(jnp.float32)
    b3 = params["b3"].astype(jnp.float32)

    grid = (b_pad // bt,)

    # Weights/biases: full arrays, same (resident) block for every grid step.
    def full(shape):
        return pl.BlockSpec(shape, lambda i: (0, 0))

    out_t = pl.pallas_call(
        mlp_kernel,
        out_shape=jax.ShapeDtypeStruct((out_f, b_pad), jnp.float32),
        grid_spec=pl.GridSpec(
            grid=grid,
            in_specs=[
                pl.BlockSpec((in_f, bt), lambda i: (0, i)),          # x tile (batch on lanes)
                full((h1_f, in_f)), full((h1_f, 1)),                 # layer 1
                full((h2_f, h1_f)), full((h2_f, 1)),                 # layer 2
                full((out_f, h2_f)), full((out_f, 1)),               # layer 3
            ],
            out_specs=pl.BlockSpec((out_f, bt), lambda i: (0, i)),
        ),
        compiler_params=pltpu.CompilerParams(
            dimension_semantics=("parallel",),                       # v7x: shard grid over 2 TCs
        ),
    )(x_t, w1, b1, w2, b2, w3, b3)

    return jnp.swapaxes(out_t, 0, 1)[:B].astype(x.dtype)            # (B, out_f)


def init_params(key, in_features, out_features, dtype=jnp.float32):
    """Deterministic init mimicking nn.Linear's uniform(-1/sqrt(fan_in), 1/sqrt(fan_in)).

    Weights stored in PyTorch layout (out, in); biases as (out, 1).
    """
    def linear_init(k, fan_in, fan_out):
        kw, kb = jax.random.split(k)
        bound = 1.0 / jnp.sqrt(jnp.asarray(fan_in, jnp.float32))
        w = jax.random.uniform(kw, (fan_out, fan_in), dtype, -bound, bound)
        b = jax.random.uniform(kb, (fan_out, 1), dtype, -bound, bound)
        return w, b

    k1, k2, k3 = jax.random.split(key, 3)
    w1, b1 = linear_init(k1, in_features, 64)
    w2, b2 = linear_init(k2, 64, 32)
    w3, b3 = linear_init(k3, 32, out_features)
    return {"w1": w1, "b1": b1, "w2": w2, "b2": b2, "w3": w3, "b3": b3}


def reference_forward(x, p, compute_dtype=jnp.bfloat16):
    """Pure-JAX reference mirroring the kernel's bf16-input / f32-accumulate path."""
    xb = jnp.swapaxes(x, 0, 1).astype(compute_dtype)                # (in_f, B)
    w1 = p["w1"].astype(compute_dtype)
    w2 = p["w2"].astype(compute_dtype)
    w3 = p["w3"].astype(compute_dtype)
    h1 = jnp.maximum(
        jnp.dot(w1, xb, preferred_element_type=jnp.float32) + p["b1"].astype(jnp.float32), 0.0)
    h2 = jnp.maximum(
        jnp.dot(w2, h1.astype(compute_dtype), preferred_element_type=jnp.float32)
        + p["b2"].astype(jnp.float32), 0.0)
    out = (jnp.dot(w3, h2.astype(compute_dtype), preferred_element_type=jnp.float32)
           + p["b3"].astype(jnp.float32))
    return jnp.swapaxes(out, 0, 1).astype(x.dtype)                   # (B, out_f)


if __name__ == "__main__":
    key = jax.random.PRNGKey(0)
    kx, kp, kx2 = jax.random.split(key, 3)

    batch = 16          # folktables rows per batch (small example)
    in_features = 10    # typical folktables feature count
    out_features = 2    # binary classification logits
    dtype = jnp.float32

    x = jax.random.normal(kx, (batch, in_features), dtype)
    params = init_params(kp, in_features, out_features, dtype)

    # Single-tile path (batch fits in one tile).
    logits = simple_net_forward(x, params)
    logits = jax.block_until_ready(logits)
    ref = reference_forward(x, params)
    assert logits.shape == (batch, out_features)
    assert jnp.allclose(logits, ref, atol=5e-3, rtol=5e-3), "mismatch vs reference (single tile)"

    # Multi-tile + padded-batch path (grid = cdiv, zero-padded last tile).
    batch2 = 160
    x2 = jax.random.normal(kx2, (batch2, in_features), dtype)
    logits2 = simple_net_forward(x2, params, batch_tile=128)
    logits2 = jax.block_until_ready(logits2)
    ref2 = reference_forward(x2, params)
    assert logits2.shape == (batch2, out_features)
    assert jnp.allclose(logits2, ref2, atol=5e-3, rtol=5e-3), "mismatch vs reference (multi tile)"

    print("KERNEL_OK")
</pallas_src>

<mosaic_0001>
module attributes {stable_mosaic.version = 11 : i64} {
  func.func @mlp_kernel(%arg0: i32, %arg1: memref<10x16xbf16, #tpu.memory_space<vmem>>, %arg2: memref<64x10xbf16, #tpu.memory_space<vmem>>, %arg3: memref<64x1xf32, #tpu.memory_space<vmem>>, %arg4: memref<32x64xbf16, #tpu.memory_space<vmem>>, %arg5: memref<32x1xf32, #tpu.memory_space<vmem>>, %arg6: memref<2x32xbf16, #tpu.memory_space<vmem>>, %arg7: memref<2x1xf32, #tpu.memory_space<vmem>>, %arg8: memref<2x16xf32, #tpu.memory_space<vmem>>) attributes {dimension_semantics = [#tpu.dimension_semantics<parallel>], iteration_bounds = array<i64: 1>, scalar_prefetch = 0 : i64, scratch_operands = 0 : i64, tpu.core_type = #tpu.core_type<tc>, window_params = [{transform_indices = @transform_0, window_bounds = array<i64: 10, 16>}, {pipeline_mode = #tpu.pipeline_mode<synchronous>, transform_indices = @transform_1, window_bounds = array<i64: 64, 10>}, {pipeline_mode = #tpu.pipeline_mode<synchronous>, transform_indices = @transform_2, window_bounds = array<i64: 64, 1>}, {pipeline_mode = #tpu.pipeline_mode<synchronous>, transform_indices = @transform_3, window_bounds = array<i64: 32, 64>}, {pipeline_mode = #tpu.pipeline_mode<synchronous>, transform_indices = @transform_4, window_bounds = array<i64: 32, 1>}, {pipeline_mode = #tpu.pipeline_mode<synchronous>, transform_indices = @transform_5, window_bounds = array<i64: 2, 32>}, {pipeline_mode = #tpu.pipeline_mode<synchronous>, transform_indices = @transform_6, window_bounds = array<i64: 2, 1>}, {transform_indices = @transform_7, window_bounds = array<i64: 2, 16>}]} {
    %c0 = arith.constant 0 : index
    %c0_0 = arith.constant 0 : index
    %0 = vector.load %arg1[%c0, %c0_0] : memref<10x16xbf16, #tpu.memory_space<vmem>>, vector<10x16xbf16>
    %c0_1 = arith.constant 0 : index
    %c0_2 = arith.constant 0 : index
    %1 = vector.load %arg2[%c0_1, %c0_2] : memref<64x10xbf16, #tpu.memory_space<vmem>>, vector<64x10xbf16>
    %cst = arith.constant dense<0.000000e+00> : vector<64x16xf32>
    %2 = tpu.matmul %1, %0, %cst {dimension_numbers = #tpu.dot_dimension_numbers<[1], [0], [0], [1], [0, 0, 1, 1], [], []>} : vector<64x10xbf16>, vector<10x16xbf16>, vector<64x16xf32> -> vector<64x16xf32>
    %c0_3 = arith.constant 0 : index
    %c0_4 = arith.constant 0 : index
    %3 = vector.load %arg3[%c0_3, %c0_4] : memref<64x1xf32, #tpu.memory_space<vmem>>, vector<64x1xf32>
    %4 = vector.broadcast %3 : vector<64x1xf32> to vector<64x16xf32>
    %5 = arith.addf %2, %4 : vector<64x16xf32>
    %cst_5 = arith.constant 0.000000e+00 : f32
    %6 = vector.broadcast %cst_5 : f32 to vector<64x16xf32>
    %7 = arith.maximumf %5, %6 : vector<64x16xf32>
    %c0_6 = arith.constant 0 : index
    %c0_7 = arith.constant 0 : index
    %8 = vector.load %arg4[%c0_6, %c0_7] : memref<32x64xbf16, #tpu.memory_space<vmem>>, vector<32x64xbf16>
    %9 = arith.truncf %7 : vector<64x16xf32> to vector<64x16xbf16>
    %cst_8 = arith.constant dense<0.000000e+00> : vector<32x16xf32>
    %10 = tpu.matmul %8, %9, %cst_8 {dimension_numbers = #tpu.dot_dimension_numbers<[1], [0], [0], [1], [0, 0, 1, 1], [], []>} : vector<32x64xbf16>, vector<64x16xbf16>, vector<32x16xf32> -> vector<32x16xf32>
    %c0_9 = arith.constant 0 : index
    %c0_10 = arith.constant 0 : index
    %11 = vector.load %arg5[%c0_9, %c0_10] : memref<32x1xf32, #tpu.memory_space<vmem>>, vector<32x1xf32>
    %12 = vector.broadcast %11 : vector<32x1xf32> to vector<32x16xf32>
    %13 = arith.addf %10, %12 : vector<32x16xf32>
    %cst_11 = arith.constant 0.000000e+00 : f32
    %14 = vector.broadcast %cst_11 : f32 to vector<32x16xf32>
    %15 = arith.maximumf %13, %14 : vector<32x16xf32>
    %c0_12 = arith.constant 0 : index
    %c0_13 = arith.constant 0 : index
    %16 = vector.load %arg6[%c0_12, %c0_13] : memref<2x32xbf16, #tpu.memory_space<vmem>>, vector<2x32xbf16>
    %17 = arith.truncf %15 : vector<32x16xf32> to vector<32x16xbf16>
    %cst_14 = arith.constant dense<0.000000e+00> : vector<2x16xf32>
    %18 = tpu.matmul %16, %17, %cst_14 {dimension_numbers = #tpu.dot_dimension_numbers<[1], [0], [0], [1], [0, 0, 1, 1], [], []>} : vector<2x32xbf16>, vector<32x16xbf16>, vector<2x16xf32> -> vector<2x16xf32>
    %c0_15 = arith.constant 0 : index
    %c0_16 = arith.constant 0 : index
    %19 = vector.load %arg7[%c0_15, %c0_16] : memref<2x1xf32, #tpu.memory_space<vmem>>, vector<2x1xf32>
    %20 = vector.broadcast %19 : vector<2x1xf32> to vector<2x16xf32>
    %21 = arith.addf %18, %20 : vector<2x16xf32>
    %c0_17 = arith.constant 0 : index
    %c0_18 = arith.constant 0 : index
    %22 = vector.load %arg8[%c0_17, %c0_18] : memref<2x16xf32, #tpu.memory_space<vmem>>, vector<2x16xf32>
    tpu.vector_store %arg8[%c0_17, %c0_18], %21 {strides = array<i32>} : memref<2x16xf32, #tpu.memory_space<vmem>>, vector<2x16xf32>,
    return
  }
  func.func @transform_0(%arg0: i32) -> (i32, i32) {
    %c0_i32 = arith.constant 0 : i32
    %c0_i32_0 = arith.constant 0 : i32
    return %c0_i32, %arg0 : i32, i32
  }
  func.func @transform_1(%arg0: i32) -> (i32, i32) {
    %c0_i32 = arith.constant 0 : i32
    %c0_i32_0 = arith.constant 0 : i32
    %c0_i32_1 = arith.constant 0 : i32
    return %c0_i32, %c0_i32_0 : i32, i32
  }
  func.func @transform_2(%arg0: i32) -> (i32, i32) {
    %c0_i32 = arith.constant 0 : i32
    %c0_i32_0 = arith.constant 0 : i32
    %c0_i32_1 = arith.constant 0 : i32
    return %c0_i32, %c0_i32_0 : i32, i32
  }
  func.func @transform_3(%arg0: i32) -> (i32, i32) {
    %c0_i32 = arith.constant 0 : i32
    %c0_i32_0 = arith.constant 0 : i32
    %c0_i32_1 = arith.constant 0 : i32
    return %c0_i32, %c0_i32_0 : i32, i32
  }
  func.func @transform_4(%arg0: i32) -> (i32, i32) {
    %c0_i32 = arith.constant 0 : i32
    %c0_i32_0 = arith.constant 0 : i32
    %c0_i32_1 = arith.constant 0 : i32
    return %c0_i32, %c0_i32_0 : i32, i32
  }
  func.func @transform_5(%arg0: i32) -> (i32, i32) {
    %c0_i32 = arith.constant 0 : i32
    %c0_i32_0 = arith.constant 0 : i32
    %c0_i32_1 = arith.constant 0 : i32
    return %c0_i32, %c0_i32_0 : i32, i32
  }
  func.func @transform_6(%arg0: i32) -> (i32, i32) {
    %c0_i32 = arith.constant 0 : i32
    %c0_i32_0 = arith.constant 0 : i32
    %c0_i32_1 = arith.constant 0 : i32
    return %c0_i32, %c0_i32_0 : i32, i32
  }
  func.func @transform_7(%arg0: i32) -> (i32, i32) {
    %c0_i32 = arith.constant 0 : i32
    %c0_i32_0 = arith.constant 0 : i32
    return %c0_i32, %arg0 : i32, i32
  }
}

</mosaic_0001>

<bundles_post_ra>
// kernel: tpu_custom_call.1
= control target key start
LH: loop header
LB: loop body
LE: loop exit
PB: predicated region body
PF: predicated region fallthrough
CT: control target
= control target key end

     0   :  { %vm124_vm0 = vcmask 1044480   ;;  %vm111_vm1 = vcmask 80896   ;;  %v468_v5 = vmov 0   ;;  %s593_s0 = inlined_call_operand.vmem [shape: bf16[10,16], index: 0, kind: input, shape index: {}]   ;;  %s594_s1 = inlined_call_operand.vmem [shape: bf16[64,10], index: 1, kind: input, shape index: {}]   ;;  %s595_s2 = inlined_call_operand.vmem [shape: f32[64,1], index: 2, kind: input, shape index: {}]   ;;  %s596_s3 = inlined_call_operand.vmem [shape: bf16[32,64], index: 3, kind: input, shape index: {}]   ;;  %s597_s4 = inlined_call_operand.vmem [shape: f32[32,1], index: 4, kind: input, shape index: {}]   ;;  %s598_s5 = inlined_call_operand.vmem [shape: bf16[2,32], index: 5, kind: input, shape index: {}]   ;;  %s599_s6 = inlined_call_operand.vmem [shape: f32[2,1], index: 6, kind: input, shape index: {}]   ;;  %s600_s7 = inlined_call_operand.hbm [shape: f32[2,16], index: 7, kind: output, shape index: {}]  }
   0x1   :  { %v437_v0 = vld [vmem:[%s593_s0] sm:$0x1f]   ;;  %v439_v3 = vld [vmem:[%s594_s1 + $0x8] sm:$0xff]   ;;  %v440_v4 = vld [vmem:[%s594_s1 + $0x10] sm:$0xff]   ;;  %435 = vset.pattern.permute.xlu0 %v468_v5  ;;  %436 = vset.pattern.permute.xlu1 %v468_v5 }
   0x2   :  { %v438_v1 = vld [vmem:[%s594_s1] sm:$0xff]   ;;  %430 = vmatprep.subr.msk.bf16.mxu0 %vm124_vm0, %v437_v0  ;;  %v126_v2 = vsel %vm124_vm0, %v437_v0, 0  ;;  %v40_v7 = vld [vmem:[%s595_s2 + $0x10] sm:$0xff]  ;;  %v39_v8 = vld [vmem:[%s595_s2 + $0x8] sm:$0xff] }
   0x3   :  { %401 = vmatpush3.bf16.msra.mxu0 %v126_v2  ;;  %402 = vmatprep.mubr.msk.bf16.mxu0 %vm111_vm1, %v438_v1  ;;  %v38_v6 = vld [vmem:[%s595_s2] sm:$0xff]  ;;  %v41_v9 = vld [vmem:[%s595_s2 + $0x18] sm:$0xff] }
   0x4   :  { %48 = vperm.xlu0 %435, %v38_v6   ;;  %58 = vperm.xlu1 %436, %v40_v7   ;;  %v441_v10 = vld [vmem:[%s594_s1 + $0x18] sm:$0xff]   ;;  %v42_v11 = vld [vmem:[%s595_s2 + $0x20] sm:$0xff] }
   0x6   :  { %403 = vmatmul.mubr.msk.bf16.vlgmr.msra.gmra.mrb[0].mxu0 %vm111_vm1, %v439_v3 }
   0x7   :  { %406 = vmatprep.mubr.msk.bf16.mxu0 %vm111_vm1, %v440_v4 }
   0x8   :  { %53 = vperm.xlu0 %435, %v39_v8   ;;  %63 = vperm.xlu1 %436, %v41_v9  }
   0x9   :  { %12 = vsyncpa [#allocation3], 0  ;;  %v43_v12 = vld [vmem:[%s595_s2 + $0x28] sm:$0xff]  ;;  %v44_v13 = vld [vmem:[%s595_s2 + $0x30] sm:$0xff]  ;;  %vm243_vm2 = vcmask 523264   ;;  %v469_v58 = vmov 0.0  }
   0xa   :  { %v45_v14 = vld [vmem:[%s595_s2 + $0x38] sm:$0xff]  ;;  %v209_v15 = vld [vmem:[%s597_s4] sm:$0xff]  ;;  %v210_v16 = vld [vmem:[%s597_s4 + $0x8] sm:$0xff]  ;;  %422 = vmatprep.subr.bf16.mxu0 %v469_v58  ;;  %vm470_vm3 = vmmov 0   ;;  %vm312_vm4 = vcmask 261120   ;;  %s471_s13 = smov [#allocation2]  }
   0xb   :  { %v211_v17 = vld [vmem:[%s597_s4 + $0x10] sm:$0xff]  ;;  %v212_v18 = vld [vmem:[%s597_s4 + $0x18] sm:$0xff]  ;;  %v306_v19 = vld [vmem:[%s599_s6] sm:$0x3]  ;;  %s364_s14 = sshll.u32 %s471_s13, 4  ;;  %vm356_vm5 = vcmask 123904   ;;  %s365_s14 = int_to_ptr.vmem [resolvable:$true] %s364_s14 }
   0xc   :  { %68 = vperm.xlu0 %435, %v42_v11   ;;  %73 = vperm.xlu1 %436, %v43_v12   ;;  %v442_v20 = vld [vmem:[%s596_s3] sm:$0xff]   ;;  %v443_v57 = vld [vmem:[%s596_s3 + $0x8] sm:$0xff]   ;;  %s444_s15 = scalar_lea.vmem %s365_s14, 32  ;;  %p449_p1 = scmp.lt.s32.totalorder %s365_s14, %s365_s14 }
   0xd   :  { %418 = vmatprep.mubr.msk.bf16.mxu1 %vm243_vm2, %v442_v20  ;;  %p445_p0 = scmp.ne.s32.totalorder %s365_s14, %s444_s15  ;;  %p450_p2 = scmp.lt.s32.totalorder %s444_s15, %s444_s15 }
   0xe   :  { %407 = vmatmul.mubr.msk.bf16.gmra.mrb[4].mxu0 %vm111_vm1, %v441_v10 }
   0xf   :  { %426 = vmatprep.mubr.msk.bf16.mxu0 %vm470_vm3, %v469_v58  ;;  %p451_p3 = por %p450_p2, %p449_p1 }
  0x10   :  { %78 = vperm.xlu0 %435, %v44_v13   ;;  %83 = vperm.xlu1 %436, %v45_v14   ;;  %v303_v13 = vld [vmem:[%s598_s5] sm:$0x1] }
  0x11   :  { %p452_p4 = pnand %p451_p3, %p445_p0 }
  0x14   :  { %215 = vperm.xlu0 %435, %v209_v15   ;;  %220 = vperm.xlu1 %436, %v210_v16  }
  0x18   :  { %225 = vperm.xlu0 %435, %v211_v17   ;;  %230 = vperm.xlu1 %436, %v212_v18  }
  0x1c   :  { %309 = vperm.xlu0 %435, %v306_v19  }
  0x83   :  { %v49_v21 = vpop.permute.xlu0 %48  ;;  %v59_v22 = vpop.permute.xlu1 %58 }
  0x87   :  { %v54_v23 = vpop.permute.xlu0 %53  ;;  %v64_v24 = vpop.permute.xlu1 %63 }
  0x8b   :  { %v69_v28 = vpop.permute.xlu0 %68  ;;  %v74_v33 = vpop.permute.xlu1 %73 }
  0x8f   :  { %v79_v40 = vpop.permute.xlu0 %78  ;;  %v84_v45 = vpop.permute.xlu1 %83 }
  0x93   :  { %v216_v59 = vpop.permute.xlu0 %215  ;;  %v221_v60 = vpop.permute.xlu1 %220 }
  0x97   :  { %v226_v61 = vpop.permute.xlu0 %225  ;;  %v231_v1 = vpop.permute.xlu1 %230 }
  0x9b   :  { %v310_v14 = vpop.permute.xlu0 %309 }
  0xd9   :  { %v404_v25 = vpop.f32.mrb[0].mxu0 }
  0xda   :  { %v171_v26 = vadd.f32 %v404_v25, %v59_v22  ;;  %v162_v27 = vpop.f32.mrb[1].mxu0 }
  0xdb   :  { %v163_v29 = vadd.f32 %v162_v27, %v49_v21  ;;  %v405_v30 = vpop.f32.mrb[2].mxu0 }
  0xdc   :  { %v174_v31 = vadd.f32 %v405_v30, %v64_v24  ;;  %v165_v32 = vpop.f32.mrb[3].mxu0  ;;  %v195_v35 = vmax.f32 %v171_v26, 0.0 }
  0xdd   :  { %v166_v34 = vadd.f32 %v165_v32, %v54_v23  ;;  %v193_v37 = vmax.f32 %v163_v29, 0.0 }
  0xde   :  { %v196_v36 = vmax.f32 %v174_v31, 0.0 }
  0xdf   :  { %v194_v38 = vmax.f32 %v166_v34, 0.0 }
  0xe0   :  { %v206_v39 = vpack.c.bf16 %v196_v36, %v195_v35 }
  0xe1   :  { %v408_v41 = vpop.f32.mrb[4].mxu0  ;;  %v205_v42 = vpack.c.bf16 %v194_v38, %v193_v37 }
  0xe2   :  { %v187_v43 = vadd.f32 %v408_v41, %v79_v40  ;;  %v178_v44 = vpop.f32.mrb[5].mxu0 }
  0xe3   :  { %v179_v46 = vadd.f32 %v178_v44, %v69_v28  ;;  %v409_v47 = vpop.f32.mrb[6].mxu0  ;;  %410 = vmatprep.subr.bf16.mxu1 %v205_v42 }
  0xe4   :  { %v190_v48 = vadd.f32 %v409_v47, %v84_v45  ;;  %v181_v49 = vpop.f32.mrb[7].mxu0  ;;  %411 = vmatpush3.bf16.msra.mxu1 %v205_v42  ;;  %v199_v51 = vmax.f32 %v187_v43, 0.0 }
  0xe5   :  { %v182_v50 = vadd.f32 %v181_v49, %v74_v33  ;;  %412 = vmatprep.subr.bf16.mxu1 %v206_v39  ;;  %v197_v53 = vmax.f32 %v179_v46, 0.0 }
  0xe6   :  { %v200_v52 = vmax.f32 %v190_v48, 0.0 }
  0xe7   :  { %v198_v54 = vmax.f32 %v182_v50, 0.0 }
  0xe8   :  { %v208_v55 = vpack.c.bf16 %v200_v52, %v199_v51  ;;  %413 = vmatpush3.bf16.msra.mxu1 %v206_v39 }
  0xe9   :  { %v207_v56 = vpack.c.bf16 %v198_v54, %v197_v53 }
  0xeb   :  { %414 = vmatprep.subr.bf16.mxu1 %v207_v56 }
  0xec   :  { %415 = vmatpush3.bf16.msra.mxu1 %v207_v56 }
  0xed   :  { %416 = vmatprep.subr.bf16.mxu1 %v208_v55 }
  0xf0   :  { %417 = vmatpush3.bf16.msra.mxu1 %v208_v55 }
  0xf3   :  { %419 = vmatmul.mubr.msk.bf16.vlgmr.msra.gmra.mrb[0].mxu1 %vm243_vm2, %v443_v57 }
 0x1c6   :  { %v420_v62 = vpop.f32.mrb[0].mxu1 }
 0x1c7   :  { %v293_v63 = vadd.f32 %v420_v62, %v226_v61  ;;  %v284_v0 = vpop.f32.mrb[1].mxu1 }
 0x1c8   :  { %v285_v2 = vadd.f32 %v284_v0, %v216_v59  ;;  %v421_v3 = vpop.f32.mrb[2].mxu1 }
 0x1c9   :  { %v296_v4 = vadd.f32 %v421_v3, %v231_v1  ;;  %v287_v5 = vpop.f32.mrb[3].mxu1  ;;  %v301_v7 = vmax.f32 %v293_v63, 0.0 }
 0x1ca   :  { %v288_v6 = vadd.f32 %v287_v5, %v221_v60  ;;  %v299_v9 = vmax.f32 %v285_v2, 0.0 }
 0x1cb   :  { %v302_v8 = vmax.f32 %v296_v4, 0.0 }
 0x1cc   :  { %v300_v10 = vmax.f32 %v288_v6, 0.0 }
 0x1cd   :  { %v305_v11 = vpack.c.bf16 %v302_v8, %v301_v7 }
 0x1ce   :  { %v304_v12 = vpack.c.bf16 %v300_v10, %v299_v9 }
 0x1d0   :  { %423 = vmatpush3.bf16.msra.mxu0 %v304_v12 }
 0x1d1   :  { %424 = vmatprep.subr.bf16.mxu0 %v469_v58 }
 0x1d4   :  { %425 = vmatpush3.bf16.msra.mxu0 %v305_v11 }
 0x1d7   :  { %427 = vmatmul.mubr.msk.bf16.vlgmr.msra.gmra.mrb[8].mxu0 %vm312_vm4, %v303_v13 }
 0x2aa   :  { %v350_v15 = vpop.f32.mrb[8].mxu0 }
 0x2ab   :  { %v351_v16 = vadd.f32 %v350_v15, %v310_v14  ;;  %v428_v17 = vpop.f32.mrb[9].mxu0 }
 0x2ac   :  { %v353_v18 = vpop.f32.mrb[10].mxu0 }
 0x2ad   :  { %v429_v19 = vpop.f32.mrb[11].mxu0  ;;  %357 = vst.msk [vmem:[#allocation2] sm:$0x3] %vm356_vm5, %v351_v16 }
 0x2ae   :  { %455 = shalt.err (!%p452_p4)
}
 0x2af   :  { %s456_s17 = scalar_lea.hbm %s600_s7, 32 }
 0x2b0   :  { %p457_p5 = scmp.ne.s32.totalorder %s600_s7, %s456_s17  ;;  %p460_p6 = scmp.lt.u32.totalorder %s456_s17, %s600_s7 }
 0x2b2   :  { %p462_p7 = pnand %p460_p6, %p457_p5 }
 0x2b4   :  { %465 = shalt.err (!%p462_p7)
}
 0x2b5   :  { %367 = dma.vmem_to_hbm [thread:$0]  %s365_s14, 32, %s600_s7, [#allocation3]  }
 0x2b6   :  { %466 = dma.done.wait [#allocation3], 32  }
 0x2b7   :  { %467 = vsyncadd [#allocation3], 4294967264 }
 0x2b8   :  { %371 = vsyncpa [#allocation3], 1 }

</bundles_post_ra>
